<compile_context>
chip_gen: v5e
topology: v5e:2x2
jax: 0.10.0
libtpu: 0.0.40
codegen_flags: <defaults>
</compile_context>

<pallas_src>
import jax
import jax.numpy as jnp
from jax.experimental import pallas as pl
from jax.experimental.pallas import tpu as pltpu

_LANE = 128
_SUBLANE = 8
_DEFAULT_MAX_TILE_BYTES = 4 * 1024 * 1024   # ~4 MiB per tile buffer
_VMEM_LIMIT_BYTES = 32 * 1024 * 1024        # safe on v5e/v6e/v7x


def _normalize_dim(dim: int, out_rank: int) -> int:
    # torch.unsqueeze allows dim in [-(x.dim()+1), x.dim()]
    if dim < 0:
        dim = dim + out_rank
    assert 0 <= dim < out_rank, f"dim out of range for unsqueeze: {dim}"
    return dim


def _copy_kernel(x_ref, o_ref):
    # Plain tile copy: in/out refs have identical kernel-visible shapes, so the
    # store is a full-width unmasked vst (no lane-1 output, no XLU relayout).
    o_ref[...] = x_ref[...]


def _choose_layout(n: int, itemsize: int, max_tile_bytes: int):
    """Pick a lane-dense flat (rows, cols) view of n elements + a row tile."""
    if n % _LANE != 0:
        return None  # caller falls back to a single full-extent block
    cols = _LANE
    while cols * 2 <= 4096 and n % (cols * 2) == 0:
        cols *= 2
    rows = n // cols
    target_rows = max(1, max_tile_bytes // (cols * itemsize))
    if rows <= _SUBLANE or target_rows >= rows:
        block_rows = rows  # full extent along rows -> always a legal block
    else:
        block_rows = max(_SUBLANE, (min(target_rows, rows) // _SUBLANE) * _SUBLANE)
    return rows, cols, block_rows


def _flat_copy(flat: jax.Array, rows: int, cols: int, block_rows: int) -> jax.Array:
    """Tiled (rows, cols) -> (rows, cols) copy through VMEM."""
    n_bytes = flat.size * jnp.dtype(flat.dtype).itemsize
    grid = (pl.cdiv(rows, block_rows),)
    return pl.pallas_call(
        _copy_kernel,
        out_shape=jax.ShapeDtypeStruct((rows, cols), flat.dtype),
        grid_spec=pltpu.PrefetchScalarGridSpec(
            num_scalar_prefetch=0,
            grid=grid,
            in_specs=[pl.BlockSpec((block_rows, cols), lambda i: (i, 0))],
            out_specs=pl.BlockSpec((block_rows, cols), lambda i: (i, 0)),
        ),
        compiler_params=pltpu.CompilerParams(
            dimension_semantics=("parallel",),
            vmem_limit_bytes=_VMEM_LIMIT_BYTES,
        ),
        cost_estimate=pl.CostEstimate(
            flops=0, transcendentals=0, bytes_accessed=2 * n_bytes
        ),
    )(flat)


def unsqueeze(x: jax.Array, dim: int, *,
              max_tile_bytes: int = _DEFAULT_MAX_TILE_BYTES) -> jax.Array:
    """Pallas equivalent of torch.Tensor.unsqueeze(dim)."""
    out_rank = x.ndim + 1
    d = _normalize_dim(dim, out_rank)
    out_shape = x.shape[:d] + (1,) + x.shape[d:]

    n = x.size
    if n == 0:
        # Zero-size edge case: nothing to copy; shape change is metadata-only.
        return jnp.reshape(x, out_shape)

    itemsize = jnp.dtype(x.dtype).itemsize
    layout = _choose_layout(n, itemsize, max_tile_bytes)
    if layout is None:
        # Fallback for sizes not divisible by 128: single full-extent (1, n)
        # block (always a legal block shape; store is masked but correct).
        # TODO(synk): odd-sized inputs larger than VMEM would need padding to a
        # lane-dense tile; not needed for this module's shapes.
        rows, cols, block_rows = 1, n, 1
    else:
        rows, cols, block_rows = layout

    # Wrapper-side reshapes are free row-major metadata changes; the kernel
    # only ever sees a lane-dense 2-D slab.
    flat = jnp.reshape(x, (rows, cols))
    out_flat = _flat_copy(flat, rows, cols, block_rows)
    return jnp.reshape(out_flat, out_shape)


class Unsqueeze:
    """Mirror of the PyTorch module: forward(x) = x.unsqueeze(dim)."""

    def __init__(self, dim: int):
        self.dim = dim

    def __call__(self, x: jax.Array) -> jax.Array:
        return unsqueeze(x, self.dim)


if __name__ == "__main__":
    key = jax.random.PRNGKey(0)

    # (B, C, H, W) = (2, 4, 16, 16), dim=1 -> (2, 1, 4, 16, 16)
    x = jax.random.normal(key, (2, 4, 16, 16), dtype=jnp.float32)
    mod = Unsqueeze(dim=1)
    y = jax.block_until_ready(mod(x))
    assert y.shape == (2, 1, 4, 16, 16), y.shape
    assert y.dtype == x.dtype
    assert jnp.array_equal(y, jnp.expand_dims(x, 1)), "mismatch vs expand_dims"

    # Negative dim (torch allows dim = -(ndim+1) .. ndim)
    y2 = jax.block_until_ready(unsqueeze(x, -1))
    assert y2.shape == (2, 4, 16, 16, 1), y2.shape
    assert jnp.array_equal(y2, jnp.expand_dims(x, -1))

    # Size not divisible by 128 -> full-extent fallback block
    x3 = jax.random.normal(key, (3, 5, 7), dtype=jnp.float32)
    y3 = jax.block_until_ready(unsqueeze(x3, 0))
    assert y3.shape == (1, 3, 5, 7), y3.shape
    assert jnp.array_equal(y3, jnp.expand_dims(x3, 0))

    # Force the tiled/grid path on a small array by shrinking the tile budget.
    x4 = jax.random.normal(key, (4, 8, 128, 128), dtype=jnp.float32)
    y4 = jax.block_until_ready(unsqueeze(x4, 2, max_tile_bytes=64 * 1024))
    assert y4.shape == (4, 8, 1, 128, 128), y4.shape
    assert jnp.array_equal(y4, jnp.expand_dims(x4, 2))

    # bf16 path (sub-32-bit packing handled by the same lane-dense copy).
    x5 = jax.random.normal(key, (2, 4, 16, 16), dtype=jnp.bfloat16)
    y5 = jax.block_until_ready(unsqueeze(x5, 0))
    assert y5.shape == (1, 2, 4, 16, 16), y5.shape
    assert jnp.array_equal(y5, jnp.expand_dims(x5, 0))

    print("KERNEL_OK")
</pallas_src>

<mosaic_0001>
module attributes {stable_mosaic.version = 11 : i64} {
  func.func @_copy_kernel(%arg0: i32, %arg1: memref<1x2048xf32, #tpu.memory_space<vmem>>, %arg2: memref<1x2048xf32, #tpu.memory_space<vmem>>) attributes {dimension_semantics = [#tpu.dimension_semantics<parallel>], iteration_bounds = array<i64: 1>, scalar_prefetch = 0 : i64, scratch_operands = 0 : i64, tpu.core_type = #tpu.core_type<tc>, window_params = [{transform_indices = @transform_0, window_bounds = array<i64: 1, 2048>}, {transform_indices = @transform_1, window_bounds = array<i64: 1, 2048>}]} {
    %c0 = arith.constant 0 : index
    %c0_0 = arith.constant 0 : index
    %0 = vector.load %arg1[%c0, %c0_0] : memref<1x2048xf32, #tpu.memory_space<vmem>>, vector<1x2048xf32>
    %c0_1 = arith.constant 0 : index
    %c0_2 = arith.constant 0 : index
    %1 = vector.load %arg2[%c0_1, %c0_2] : memref<1x2048xf32, #tpu.memory_space<vmem>>, vector<1x2048xf32>
    tpu.vector_store %arg2[%c0_1, %c0_2], %0 {strides = array<i32>} : memref<1x2048xf32, #tpu.memory_space<vmem>>, vector<1x2048xf32>,
    return
  }
  func.func @transform_0(%arg0: i32) -> (i32, i32) {
    %c0_i32 = arith.constant 0 : i32
    %c0_i32_0 = arith.constant 0 : i32
    return %arg0, %c0_i32 : i32, i32
  }
  func.func @transform_1(%arg0: i32) -> (i32, i32) {
    %c0_i32 = arith.constant 0 : i32
    %c0_i32_0 = arith.constant 0 : i32
    return %arg0, %c0_i32 : i32, i32
  }
}

</mosaic_0001>

<bundles_post_ra>
// kernel: tpu_custom_call.1
= control target key start
LH: loop header
LB: loop body
LE: loop exit
PB: predicated region body
PF: predicated region fallthrough
CT: control target
= control target key end

     0   :  { %6 = vsyncpa [#allocation3], 0  ;;  %s116_s0 = inlined_call_operand.hbm [shape: f32[1,2048], index: 0, kind: input, shape index: {}]   ;;  %s117_s1 = inlined_call_operand.hbm [shape: f32[1,2048], index: 1, kind: output, shape index: {}]  }
   0x1   :  { %7 = vsyncpa [#allocation4], 0  ;;  %s13_s8 = sshll.u32 %s116_s0, 4  ;;  %s98_s9 = smov [#allocation2]   ;;  %s14_s8 = int_to_ptr.hbm [resolvable:$true] %s13_s8 }
   0x2   :  { %s15_s10 = sshll.u32 %s98_s9, 4  ;;  %s16_s10 = int_to_ptr.vmem [resolvable:$true] %s15_s10 }
   0x3   :  { %18 = dma.hbm_to_vmem [thread:$0]  %s14_s8, 256, %s16_s10, [#allocation3]  }
   0x4   :  { %94 = dma.done.wait [#allocation3], 256  }
   0x5   :  { %95 = vsyncadd [#allocation3], 4294967040  ;;  %s99_s11 = smov [#allocation5]   ;;  %s34_s15 = sshll.u32 %s117_s1, 4  ;;  %v23_v0 = vld [vmem:[#allocation2] sm:$0xff]  ;;  %v24_v1 = vld [vmem:[#allocation2 + $0x8] sm:$0xff]  ;;  %s35_s15 = int_to_ptr.hbm [resolvable:$true] %s34_s15 }
   0x6   :  { %s32_s12 = sshll.u32 %s99_s11, 4  ;;  %25 = vst [vmem:[#allocation5] sm:$0xff] %v23_v0  ;;  %s33_s12 = int_to_ptr.vmem [resolvable:$true] %s32_s12 }
   0x7   :  { %26 = vst [vmem:[#allocation5 + $0x8] sm:$0xff] %v24_v1 }
   0x8   :  { %37 = dma.vmem_to_hbm [thread:$0]  %s33_s12, 256, %s35_s15, [#allocation4]  }
   0x9   :  { %96 = dma.done.wait [#allocation4], 256  }
   0xa   :  { %97 = vsyncadd [#allocation4], 4294967040 }
   0xb   :  { %42 = vsyncpa [#allocation3], 1 }
   0xc   :  { %43 = vsyncpa [#allocation4], 1 }

</bundles_post_ra>
